<compile_context>
chip_gen: v7x
topology: tpu7x:2x2x1
jax: 0.10.0
libtpu: 0.0.40
codegen_flags: <defaults>
</compile_context>

<pallas_src>
import jax
import jax.numpy as jnp
from jax.experimental import pallas as pl
from jax.experimental.pallas import tpu as pltpu


def _embedding_kernel(x_ref, w_ref, pos_ref, o_ref):
    # x_ref  : (TM, P)   TM rows (= Bt * n_patches) per grid step
    # w_ref  : (P, H)    resident across all steps (constant index_map)
    # pos_ref: (TM, H)   f32, bias folded in, pre-tiled to TM rows, resident
    # o_ref  : (TM, H)   unpadded output tile
    y = jnp.dot(x_ref[...], w_ref[...], preferred_element_type=jnp.float32)  # MXU, f32 acc
    o_ref[...] = (y + pos_ref[...]).astype(o_ref.dtype)


def _vmem_budget_bytes():
    """Generation-aware scoped-VMEM cap (~80% of physical per-TensorCore VMEM)."""
    try:
        cap = int(pltpu.get_tpu_info().vmem_capacity_bytes)
    except Exception:
        cap = 64 << 20  # conservative fallback = v7x per-core VMEM
    return int(cap * 0.8)


def _tile_vmem_need(tm, P, H, x_itemsize):
    return (2 * tm * P * x_itemsize      # x tile, double-buffered
            + 2 * tm * H * x_itemsize    # out tile, double-buffered
            + 2 * P * H * x_itemsize     # W, counted 2x (default double-buffering)
            + 2 * tm * H * 4             # pos(+bias) in f32, counted 2x
            + (2 << 20))                 # headroom


def _pick_batch_tile(B, N, P, H, x_itemsize, *, vmem_budget, target_rows, min_steps):
    """Largest batch-tile Bt (divisor of B) such that the (Bt*N)-row tile obeys the sublane
    rule, the grid keeps >= min(min_steps, B) steps, and the tile fits the VMEM budget."""
    steps_floor = min(min_steps, B)
    best = None
    for bt in range(1, B + 1):
        if B % bt:
            continue
        tm = bt * N
        if tm % 8 != 0 and bt != B:      # (8,128) sublane rule on the row-tile dim
            continue
        if B // bt < steps_floor:        # keep the pipeline / both v7x cores busy
            continue
        if bt > 1:
            if tm > max(target_rows, N):
                continue
            if _tile_vmem_need(tm, P, H, x_itemsize) > vmem_budget:
                continue
        best = bt
    if best is None:
        best = B  # degenerate fallback: one full-array step
        # TODO(synk): split along n_patches instead when B*n_patches breaks the sublane rule
    return best


def embedding_block_forward(x, w, b, pos, *, min_steps=4):
    """x: (B, N, P); w: (P, H); b: (H,) or (1, H); pos: (1, N, H)  ->  (B, N, H).

    Works for f32 or bf16 x/W (cast x in the caller for bf16); MXU accumulation and the
    bias+pos add stay in f32 either way.
    """
    B, N, P = x.shape
    H = w.shape[1]
    dtype = x.dtype
    itemsize = jnp.dtype(dtype).itemsize

    vmem_budget = _vmem_budget_bytes()
    # Bigger tiles amortize the ~0.35 us per-step overhead; v7x (64 MiB VMEM) stays smaller.
    target_rows = 2048 if vmem_budget >= (96 << 20) else 512

    Bt = _pick_batch_tile(B, N, P, H, itemsize,
                          vmem_budget=vmem_budget,
                          target_rows=target_rows, min_steps=min_steps)
    TM = Bt * N
    grid = (B // Bt,)

    # Fold bias into the positional embeddings once (module constants) and pre-tile to TM
    # rows, kept in f32 so the add happens against the f32 MXU accumulator.
    pos_b = (pos.reshape(N, H).astype(jnp.float32)
             + b.reshape(1, H).astype(jnp.float32))
    pos_tiled = jnp.tile(pos_b, (Bt, 1))          # (TM, H) f32
    w2d = w.astype(dtype)                          # (P, H)
    x2d = x.reshape(B * N, P)                      # metadata-only reshape in HBM

    vmem_limit = int(min(max(_tile_vmem_need(TM, P, H, itemsize), 16 << 20), vmem_budget))

    out2d = pl.pallas_call(
        _embedding_kernel,
        out_shape=jax.ShapeDtypeStruct((B * N, H), dtype),
        grid_spec=pltpu.PrefetchScalarGridSpec(
            num_scalar_prefetch=0,
            grid=grid,
            in_specs=[
                pl.BlockSpec((TM, P), lambda i: (i, 0)),   # x rows for this step
                pl.BlockSpec((P, H), lambda i: (0, 0)),    # W: full, resident
                pl.BlockSpec((TM, H), lambda i: (0, 0)),   # pos(+bias): full, resident, f32
            ],
            out_specs=pl.BlockSpec((TM, H), lambda i: (i, 0)),
        ),
        compiler_params=pltpu.CompilerParams(
            dimension_semantics=("parallel",),
            vmem_limit_bytes=vmem_limit,
        ),
    )(x2d, w2d, pos_tiled)

    return out2d.reshape(B, N, H)


def trunc_normal(key, shape, std=0.02, a=-2.0, b=2.0, dtype=jnp.float32):
    # N(0, std^2) truncated to absolute bounds [a, b] (timm/MONAI trunc_normal_ semantics).
    u = jax.random.truncated_normal(key, a / std, b / std, shape, dtype)
    return u * std


if __name__ == "__main__":
    # Module config: in_channels=4, img_size=(16,16), patch_size=(4,4)
    #   -> n_patches = 16, patch_dim = 4*4*4 = 64 ; hidden_size=32, num_heads=4, dropout=0.0
    B = 2
    in_channels = 4
    patch_size = (4, 4)
    img_size = (16, 16)
    n_patches = (img_size[0] // patch_size[0]) * (img_size[1] // patch_size[1])  # 16
    patch_dim = in_channels * patch_size[0] * patch_size[1]                       # 64
    hidden_size = 32

    key = jax.random.PRNGKey(0)
    kx, kw, kp = jax.random.split(key, 3)

    # Deterministic params matching __init__: trunc_normal Linear weight, zero bias,
    # trunc_normal position_embeddings, zero cls_token (unused in forward).
    w = trunc_normal(kw, (patch_dim, hidden_size))            # (P, H) = torch weight.T
    b = jnp.zeros((hidden_size,), jnp.float32)
    pos = trunc_normal(kp, (1, n_patches, hidden_size))
    _cls_token = jnp.zeros((1, 1, hidden_size), jnp.float32)  # not used in forward
    # TODO(synk): nonzero training-time dropout would need pltpu.prng_seed/prng_random_bits;
    # dropout_rate=0.0 (and eval mode) makes it an identity here.

    # Input: already-flattened patches (B, n_patches, patch_dim).
    x = jax.random.normal(kx, (B, n_patches, patch_dim), jnp.float32)

    out = embedding_block_forward(x, w, b, pos)
    out = jax.block_until_ready(out)

    # Reference in plain JAX.
    ref = jnp.einsum("bnp,ph->bnh", x, w) + b + pos
    assert out.shape == (B, n_patches, hidden_size)
    assert jnp.allclose(out, ref, atol=1e-5, rtol=1e-5)

    print("KERNEL_OK")
</pallas_src>

<mosaic_0001>
module attributes {stable_mosaic.version = 11 : i64} {
  func.func @_embedding_kernel(%arg0: i32, %arg1: memref<16x64xf32, #tpu.memory_space<vmem>>, %arg2: memref<64x32xf32, #tpu.memory_space<vmem>>, %arg3: memref<16x32xf32, #tpu.memory_space<vmem>>, %arg4: memref<16x32xf32, #tpu.memory_space<vmem>>) attributes {dimension_semantics = [#tpu.dimension_semantics<parallel>], iteration_bounds = array<i64: 2>, scalar_prefetch = 0 : i64, scratch_operands = 0 : i64, tpu.core_type = #tpu.core_type<tc>, window_params = [{transform_indices = @transform_0, window_bounds = array<i64: 16, 64>}, {pipeline_mode = #tpu.pipeline_mode<synchronous>, transform_indices = @transform_1, window_bounds = array<i64: 64, 32>}, {pipeline_mode = #tpu.pipeline_mode<synchronous>, transform_indices = @transform_2, window_bounds = array<i64: 16, 32>}, {transform_indices = @transform_3, window_bounds = array<i64: 16, 32>}]} {
    %c0 = arith.constant 0 : index
    %c0_0 = arith.constant 0 : index
    %0 = vector.load %arg1[%c0, %c0_0] : memref<16x64xf32, #tpu.memory_space<vmem>>, vector<16x64xf32>
    %c0_1 = arith.constant 0 : index
    %c0_2 = arith.constant 0 : index
    %1 = vector.load %arg2[%c0_1, %c0_2] : memref<64x32xf32, #tpu.memory_space<vmem>>, vector<64x32xf32>
    %cst = arith.constant dense<0.000000e+00> : vector<16x32xf32>
    %2 = tpu.matmul %0, %1, %cst {dimension_numbers = #tpu.dot_dimension_numbers<[1], [0], [0], [1], [0, 0, 1, 1], [], []>} : vector<16x64xf32>, vector<64x32xf32>, vector<16x32xf32> -> vector<16x32xf32>
    %c0_3 = arith.constant 0 : index
    %c0_4 = arith.constant 0 : index
    %3 = vector.load %arg3[%c0_3, %c0_4] : memref<16x32xf32, #tpu.memory_space<vmem>>, vector<16x32xf32>
    %4 = arith.addf %2, %3 : vector<16x32xf32>
    %c0_5 = arith.constant 0 : index
    %c0_6 = arith.constant 0 : index
    %5 = vector.load %arg4[%c0_5, %c0_6] : memref<16x32xf32, #tpu.memory_space<vmem>>, vector<16x32xf32>
    tpu.vector_store %arg4[%c0_5, %c0_6], %4 {strides = array<i32>} : memref<16x32xf32, #tpu.memory_space<vmem>>, vector<16x32xf32>,
    return
  }
  func.func @transform_0(%arg0: i32) -> (i32, i32) {
    %c0_i32 = arith.constant 0 : i32
    %c0_i32_0 = arith.constant 0 : i32
    return %arg0, %c0_i32 : i32, i32
  }
  func.func @transform_1(%arg0: i32) -> (i32, i32) {
    %c0_i32 = arith.constant 0 : i32
    %c0_i32_0 = arith.constant 0 : i32
    %c0_i32_1 = arith.constant 0 : i32
    return %c0_i32, %c0_i32_0 : i32, i32
  }
  func.func @transform_2(%arg0: i32) -> (i32, i32) {
    %c0_i32 = arith.constant 0 : i32
    %c0_i32_0 = arith.constant 0 : i32
    %c0_i32_1 = arith.constant 0 : i32
    return %c0_i32, %c0_i32_0 : i32, i32
  }
  func.func @transform_3(%arg0: i32) -> (i32, i32) {
    %c0_i32 = arith.constant 0 : i32
    %c0_i32_0 = arith.constant 0 : i32
    return %arg0, %c0_i32 : i32, i32
  }
}

</mosaic_0001>

<bundles_post_ra>
// kernel: tpu_custom_call.1
= control target key start
LH: loop header
LB: loop body
LE: loop exit
PB: predicated region body
PF: predicated region fallthrough
CT: control target
= control target key end

     0   :  { %8 = vsyncpa [#allocation3], 0  ;;  %s665_s0 = inlined_call_operand.vmem [shape: f32[32,64], index: 0, kind: input, shape index: {}]   ;;  %s666_s1 = inlined_call_operand.vmem [shape: f32[64,32], index: 1, kind: input, shape index: {}]   ;;  %s667_s2 = inlined_call_operand.vmem [shape: f32[16,32], index: 2, kind: input, shape index: {}]   ;;  %s668_s3 = inlined_call_operand.hbm [shape: f32[32,32], index: 3, kind: output, shape index: {}]  }
   0x1   :  { %10 = vsyncpa [#allocation3 + $0x1], 0  ;;  %s533_s12 = smov 0   ;;  %s535_s13 = smov 0  }
   0x2   :  { %s537_s14 = smov 0   ;;  %s539_s15 = smov 0  }
   0x3 LB: > { %s554_s16 = sadd.s32 4294967295, %s508_s15   ;;  %s345_s17 = sadd.s32 4294967294, %s508_s15   ;;  %s508_s15 = sphi %s539_s15, %s674_s15   ;;  %s504_s14 = sphi %s537_s14, %s673_s14   ;;  %s500_s13 = sphi %s535_s13, %s672_s13   ;;  %s496_s12 = sphi %s533_s12, %s671_s12  }
   0x4   : > { %s558_s18 = sadd.s32 1, %s508_s15   ;;  %s91_s19 = sadd.s32 1, %s504_s14 }
   0x5   : > { %s88_s20 = ssub.s32 %s508_s15, %s558_s18  ;;  %p101_p0 = scmp.ne.s32.totalorder %s504_s14, %s500_s13 }
   0x6   : > { %p89_p1 = scmp.eq.s32.totalorder %s88_s20, 0  ;;  %p102_p2 = scmp.eq.s32.totalorder %s554_s16, 1 }
   0x7   : > { %p107_p3 = scmp.ne.s32.totalorder %s500_s13, %s496_s12  ;;  %p108_p4 = scmp.eq.s32.totalorder %s345_s17, 1 }
   0x8   : > { %s569_s21 = scalar_select %p89_p1, %s504_s14, %s91_s19  }
   0x9   : > { %p571_p5 = por %p102_p2, %p101_p0  ;;  %p575_p6 = por %p108_p4, %p107_p3 }
   0xa   : > { %p348_p7 = scmp.ge.s32.totalorder %s508_s15, 1  ;;  %p141_p8 = scmp.lt.s32.totalorder %s508_s15, 3 }
   0xc   : > { %p142_p9 = pnand %p348_p7, %p141_p8 }
   0xd   : > { %v174_v0 = vld [vmem:[%s666_s1] sm:$0xff] (!%p142_p9)  ;;  %v175_v1 = vld [vmem:[%s666_s1 + $0x8] sm:$0xff] (!%p142_p9)  ;;  %v176_v2 = vld [vmem:[%s666_s1 + $0x10] sm:$0xff] (!%p142_p9)  ;;  %s350_s30 = sshll.u32 (!%p142_p9), %s554_s16, 1  ;;  %vm184_vm0 = vcmask (!%p142_p9), 523264   ;;  %s162_s27 = sand.u32 (!%p142_p9), 1, %s500_s13  }
   0xe   : > { %145 = sbr.rel (%p142_p9) target bundleno = 262 (0x106), region = 32  ;;  %v389_v3 = vpack.c.bf16 (!%p142_p9), %v175_v1, %v174_v0  ;;  %v177_v4 = vld [vmem:[%s666_s1 + $0x18] sm:$0xff] (!%p142_p9)  ;;  %p166_p10 = scmp.lt.s32.totalorder (!%p142_p9), %s350_s30, 3  ;;  %v178_v6 = vld [vmem:[%s666_s1 + $0x20] sm:$0xff] (!%p142_p9)  ;;  %v179_v7 = vld [vmem:[%s666_s1 + $0x28] sm:$0xff] (!%p142_p9)  ;;  %vm266_vm1 = vcmask (!%p142_p9), 261120  }
   0xf   : > { %v393_v5 = vpack.c.bf16 (!%p142_p9), %v177_v4, %v176_v2  ;;  %v397_v8 = vpack.c.bf16 (!%p142_p9), %v179_v7, %v178_v6  ;;  %v180_v9 = vld [vmem:[%s666_s1 + $0x30] sm:$0xff] (!%p142_p9)  ;;  %v181_v10 = vld [vmem:[%s666_s1 + $0x38] sm:$0xff] (!%p142_p9)  ;;  %s349_s28 = sshll.u32 (!%p142_p9), %s162_s27, 4  ;;  %v183_v14 = vld [vmem:[%s667_s2 + $0x8] sm:$0xff] (!%p142_p9)  ;;  %s359_s6 = sshll.u32 (!%p142_p9), %s554_s16, 8 }
  0x10   : > { %390 = vmatprep.subr.bf16.mxu0 (!%p142_p9), %v389_v3  ;;  %v401_v12 = vpack.c.bf16 (!%p142_p9), %v181_v10, %v180_v9  ;;  %s164_s4 = scalar_lea.vmem (!%p142_p9), [#allocation2], %s349_s28  ;;  %v182_v15 = vld [vmem:[%s667_s2] sm:$0xff] (!%p142_p9)  ;;  %s622_s11 = scalar_lea.hbm (!%p142_p9), %s668_s3, %s359_s6 }
  0x11   : > { %392 = vmatpush3.bf16.msra.mxu0 (!%p142_p9), %v389_v3  ;;  %s283_s5 = sshll.u32 (!%p142_p9), %s164_s4, 4  ;;  %s624_s16 = scalar_lea.sflag (!%p142_p9), [#allocation3], %s162_s27  ;;  %s617_s5 = int_to_ptr.vmem [resolvable:$true] %s283_s5 }
  0x12   : > { %394 = vmatprep.subr.bf16.mxu0 (!%p142_p9), %v393_v5  ;;  %s446_s17 = scalar_lea.vmem (!%p142_p9), %s617_s5, 256  ;;  %s510_s19 = smov (!%p142_p9), [#allocation2]  }
  0x13   : > { %p447_p11 = scmp.ne.s32.totalorder (!%p142_p9), %s617_s5, %s446_s17  ;;  %s450_s20 = sshll.u32 (!%p142_p9), %s510_s19, 4  ;;  %s451_s20 = int_to_ptr.vmem [resolvable:$false] %s450_s20 }
  0x14   : > { %s452_s24 = scalar_lea.vmem (!%p142_p9), %s451_s20, 512  ;;  %p453_p0 = scmp.lt.s32.totalorder (!%p142_p9), %s617_s5, %s451_s20 }
  0x15   : > { %s676_s30 = smov (!%p166_p10, %s350_s30), 3  ;;  %396 = vmatpush3.bf16.msra.mxu0 %v393_v5  ;;  %p448_p12 = pnand %p447_p11, %p571_p5 }
  0x16   : > { %s351_s10 = sshll.u32 %s676_s30, 3  ;;  %398 = vmatprep.subr.bf16.mxu0 %v397_v8  ;;  %p454_p1 = scmp.lt.s32.totalorder %s452_s24, %s446_s17 }
  0x17   : > { %s169_s26 = scalar_lea.vmem %s665_s0, %s351_s10  ;;  %p449_p13 = pneg %p448_p12 }
  0x18   : > { %v172_v11 = vld [vmem:[%s169_s26] sm:$0xff]  ;;  %v173_v13 = vld [vmem:[%s169_s26 + $0x8] sm:$0xff]  ;;  %p455_p2 = por %p454_p1, %p453_p0 }
  0x19   : > { %386 = vmatprep.mubr.msk.f32.mxu0 %vm184_vm0, %v172_v11  ;;  %400 = vmatpush3.bf16.msra.mxu0 %v397_v8 }
  0x1a   : > { %402 = vmatprep.subr.bf16.mxu0 %v401_v12  ;;  %p456_p3 = pnand %p455_p2, %p449_p13 }
  0x1d   : > { %404 = vmatpush3.bf16.msra.mxu0 %v401_v12 }
  0x20   : > { %387 = vmatmul.mubr.msk.f32.vlgmr.msra.gmra.mrb[0].mxu0 %vm184_vm0, %v173_v13 }
  0xf3   : > { %v388_v16 = vpop.f32.mrb[0].mxu0 }
  0xf4   : > { %v263_v17 = vadd.f32 %v388_v16, %v183_v14  ;;  %v257_v18 = vpop.f32.mrb[1].mxu0 }
  0xf5   : > { %v258_v19 = vadd.f32 %v257_v18, %v182_v15 }
  0xf6   : > { %268 = vst.msk [vmem:[%s164_s4 + $0x8] sm:$0xff] %vm266_vm1, %v263_v17 }
  0xf7   : > { %267 = vst.msk [vmem:[%s164_s4] sm:$0xff] %vm266_vm1, %v258_v19 }
  0xf8   : > { %459 = shalt.err (!%p456_p3)
}
  0xf9   : > { %s460_s25 = scalar_lea.hbm %s622_s11, 256  ;;  %s464_s28 = scalar_lea.hbm %s668_s3, 512 }
  0xfa   : > { %p461_p4 = scmp.ne.s32.totalorder %s622_s11, %s460_s25  ;;  %p465_p9 = scmp.lt.u32.totalorder %s622_s11, %s668_s3 }
  0xfb   : > { %p466_p10 = scmp.lt.u32.totalorder %s464_s28, %s460_s25  ;;  %p468_p12 = scmp.lt.u32.totalorder %s460_s25, %s622_s11 }
  0xfc   : > { %p462_p7 = pnand %p461_p4, %p571_p5 }
  0xfd   : > { %p467_p11 = por %p466_p10, %p465_p9 }
  0xfe   : > { %p463_p8 = pneg %p462_p7 }
  0xff   : > { %p469_p13 = por %p468_p12, %p467_p11 }
 0x101   : > { %p470_p0 = pnand %p469_p13, %p463_p8 }
 0x103   : > { %473 = shalt.err (!%p470_p0)
}
 0x104   : > { %s511_s4 = smov 128   ;;  %s512_s6 = smov 8  }
 0x105   : > { %405 = dma.vmem_to_hbm [thread:$0]  (%p571_p5), %s617_s5, 256, %s622_s11, %s624_s16, %s511_s4, %s511_s4, %s512_s6  }
 0x106 PF: > { %p411_p1 = scmp.ge.s32.totalorder %s508_s15, 2  ;;  %s298_s7 = sand.u32 1, %s496_s12  }
 0x107   : > { %s299_s8 = scalar_lea.sflag [#allocation3], %s298_s7 }
 0x108   : > { %p408_p2 = pnand %p411_p1, %p575_p6 }
 0x10a   : > { %491 = dma.done.wait (!%p408_p2), %s299_s8, 256  }
 0x10b   : > { %493 = vsyncadd (!%p408_p2), %s299_s8, 4294967040  ;;  %p13_p3 = scmp.ge.s32.totalorder %s558_s18, 4   ;;  %s671_s12 = smov %s500_s13 }
 0x10c   : > { %s672_s13 = smov %s504_s14  ;;  %s673_s14 = smov %s569_s21 }
 0x10d   : > { %s674_s15 = smov %s558_s18  ;;  %15 = sbr.rel (!%p13_p3) target bundleno = 3 (0x3), region = 67 }
 0x114   :  { %304 = vsyncpa [#allocation3], 1 }
 0x115   :  { %306 = vsyncpa [#allocation3 + $0x1], 1 }

</bundles_post_ra>
